<compile_context>
chip_gen: v7x
topology: tpu7x:2x2x1
jax: 0.10.0
libtpu: 0.0.40
codegen_flags: <defaults>
</compile_context>

<pallas_src>
import math
import functools

import jax
import jax.numpy as jnp
from jax.experimental import pallas as pl
from jax.experimental.pallas import tpu as pltpu

STATE_SIZE = 16
ACTION_SIZE = 6
HIDDEN = 64
PAD_ACT = 128          # lane-dense width for the third matmul (6 -> 128)
OUT_W = 8              # columns actually stored to HBM (>= ACTION_SIZE)
NEG_BIG = -1e30        # pad-column bias -> exp() underflows to exactly 0 (f32)


def _policy_kernel(x_ref, w1_ref, b1_ref, w2_ref, b2_ref, w3_ref, b3_ref, o_ref):
    x = x_ref[...]                                                   # (TB, 16)
    h1 = jnp.dot(x, w1_ref[...], preferred_element_type=jnp.float32) + b1_ref[...]
    h1 = jnp.maximum(h1, 0.0)                                        # relu
    h2 = jnp.dot(h1, w2_ref[...], preferred_element_type=jnp.float32) + b2_ref[...]
    h2 = jnp.maximum(h2, 0.0)                                        # relu
    logits = jnp.dot(h2, w3_ref[...], preferred_element_type=jnp.float32) + b3_ref[...]
    # Only the first OUT_W columns matter; padded ones (>= ACTION_SIZE) carry
    # a NEG_BIG bias so they never win the max and exp() to exactly 0.
    lg = logits[:, :OUT_W]                                           # (TB, 8)
    m = jnp.max(lg, axis=-1, keepdims=True)
    e = jnp.exp(lg - m)
    denom = jnp.sum(e, axis=-1, keepdims=True)
    o_ref[...] = (e / denom).astype(o_ref.dtype)                     # exact softmax


def _round_up(n, m):
    return ((n + m - 1) // m) * m


@functools.partial(jax.jit, static_argnames=("tb",))
def policy_network_forward(x, params, *, tb=2048):
    """x: (B, STATE_SIZE) f32 -> (B, ACTION_SIZE) f32 action probabilities."""
    w1, b1, w2, b2, w3, b3 = params
    B = x.shape[0]

    # Batch tile: multiple of 8 sublanes.  Cap at ~half the batch so the grid
    # has >= 2 tiles when possible (lets v7x's two TensorCores split the work).
    B8 = _round_up(max(B, 1), 8)
    half = _round_up(pl.cdiv(B8, 2), 8)
    TB = max(8, min(tb, half))
    B_pad = _round_up(B8, TB)
    if B_pad != B:
        x = jnp.pad(x, ((0, B_pad - B), (0, 0)))

    # Lane-dense action axis for the matmul: zero-pad w3 columns, NEG_BIG bias
    # on the padded columns.
    w3p = jnp.pad(w3, ((0, 0), (0, PAD_ACT - ACTION_SIZE)))
    b3p = jnp.pad(b3, ((0, 0), (0, PAD_ACT - ACTION_SIZE)), constant_values=NEG_BIG)

    grid = (B_pad // TB,)

    # Weights/biases: full-array block, constant block index -> VMEM-resident
    # across the entire batch grid (loaded from HBM once per call).
    def resident(a):
        return pl.BlockSpec(a.shape, lambda i, nd=a.ndim: (0,) * nd)

    flops = 2 * B_pad * (STATE_SIZE * HIDDEN + HIDDEN * HIDDEN + HIDDEN * PAD_ACT)
    bytes_accessed = 4 * (x.size + w1.size + b1.size + w2.size + b2.size
                          + w3p.size + b3p.size + B_pad * OUT_W)

    out = pl.pallas_call(
        _policy_kernel,
        out_shape=jax.ShapeDtypeStruct((B_pad, OUT_W), jnp.float32),
        grid=grid,
        in_specs=[pl.BlockSpec((TB, STATE_SIZE), lambda i: (i, 0)),
                  resident(w1), resident(b1),
                  resident(w2), resident(b2),
                  resident(w3p), resident(b3p)],
        out_specs=pl.BlockSpec((TB, OUT_W), lambda i: (i, 0)),
        compiler_params=pltpu.CompilerParams(
            dimension_semantics=("parallel",)),   # v7x: both TCs take tiles
        cost_estimate=pl.CostEstimate(
            flops=flops,
            transcendentals=B_pad * OUT_W,
            bytes_accessed=bytes_accessed),
    )(x, w1, b1, w2, b2, w3p, b3p)

    return out[:B, :ACTION_SIZE]


def init_params(key):
    """Deterministic init mimicking nn.Linear default (uniform +/- 1/sqrt(fan_in)).

    Returned weights are (in_features, out_features) — transposed relative to
    PyTorch's (out, in) storage, but mathematically the same layer.
    """
    ks = jax.random.split(key, 6)

    def linear(kw, kb, fan_in, fan_out):
        bound = 1.0 / math.sqrt(fan_in)
        w = jax.random.uniform(kw, (fan_in, fan_out), jnp.float32, -bound, bound)
        b = jax.random.uniform(kb, (1, fan_out), jnp.float32, -bound, bound)
        return w, b

    w1, b1 = linear(ks[0], ks[1], STATE_SIZE, HIDDEN)
    w2, b2 = linear(ks[2], ks[3], HIDDEN, HIDDEN)
    w3, b3 = linear(ks[4], ks[5], HIDDEN, ACTION_SIZE)
    return (w1, b1, w2, b2, w3, b3)


if __name__ == "__main__":
    key = jax.random.PRNGKey(0)
    pkey, xkey = jax.random.split(key)
    params = init_params(pkey)
    w1, b1, w2, b2, w3, b3 = params

    # Small case (single tile).
    B = 8
    x = jax.random.normal(xkey, (B, STATE_SIZE), jnp.float32)
    probs = jax.block_until_ready(policy_network_forward(x, params))

    assert probs.shape == (B, ACTION_SIZE)
    assert bool(jnp.all(jnp.isfinite(probs)))
    assert bool(jnp.all(probs >= 0.0))
    assert bool(jnp.allclose(jnp.sum(probs, axis=1), 1.0, atol=1e-4))

    # Cross-check against plain-JAX reference.
    h = jnp.maximum(x @ w1 + b1, 0.0)
    h = jnp.maximum(h @ w2 + b2, 0.0)
    ref = jax.nn.softmax(h @ w3 + b3, axis=1)
    assert bool(jnp.allclose(probs, ref, atol=2e-3))

    # Larger, ragged batch exercises the multi-tile (>= 2 tiles) grid path.
    xb = jax.random.normal(jax.random.PRNGKey(1), (1000, STATE_SIZE), jnp.float32)
    pb = jax.block_until_ready(policy_network_forward(xb, params))
    hb = jnp.maximum(xb @ w1 + b1, 0.0)
    hb = jnp.maximum(hb @ w2 + b2, 0.0)
    refb = jax.nn.softmax(hb @ w3 + b3, axis=1)
    assert pb.shape == (1000, ACTION_SIZE)
    assert bool(jnp.allclose(jnp.sum(pb, axis=1), 1.0, atol=1e-4))
    assert bool(jnp.allclose(pb, refb, atol=2e-3))

    print("KERNEL_OK")
</pallas_src>

<mosaic_0001>
module attributes {stable_mosaic.version = 11 : i64} {
  func.func @_policy_kernel(%arg0: i32, %arg1: memref<8x16xf32, #tpu.memory_space<vmem>>, %arg2: memref<16x64xf32, #tpu.memory_space<vmem>>, %arg3: memref<1x64xf32, #tpu.memory_space<vmem>>, %arg4: memref<64x64xf32, #tpu.memory_space<vmem>>, %arg5: memref<1x64xf32, #tpu.memory_space<vmem>>, %arg6: memref<64x128xf32, #tpu.memory_space<vmem>>, %arg7: memref<1x128xf32, #tpu.memory_space<vmem>>, %arg8: memref<8x8xf32, #tpu.memory_space<vmem>>) attributes {dimension_semantics = [#tpu.dimension_semantics<parallel>], iteration_bounds = array<i64: 1>, scalar_prefetch = 0 : i64, scratch_operands = 0 : i64, tpu.core_type = #tpu.core_type<tc>, window_params = [{transform_indices = @transform_0, window_bounds = array<i64: 8, 16>}, {pipeline_mode = #tpu.pipeline_mode<synchronous>, transform_indices = @transform_1, window_bounds = array<i64: 16, 64>}, {pipeline_mode = #tpu.pipeline_mode<synchronous>, transform_indices = @transform_2, window_bounds = array<i64: 1, 64>}, {pipeline_mode = #tpu.pipeline_mode<synchronous>, transform_indices = @transform_3, window_bounds = array<i64: 64, 64>}, {pipeline_mode = #tpu.pipeline_mode<synchronous>, transform_indices = @transform_4, window_bounds = array<i64: 1, 64>}, {pipeline_mode = #tpu.pipeline_mode<synchronous>, transform_indices = @transform_5, window_bounds = array<i64: 64, 128>}, {pipeline_mode = #tpu.pipeline_mode<synchronous>, transform_indices = @transform_6, window_bounds = array<i64: 1, 128>}, {transform_indices = @transform_7, window_bounds = array<i64: 8, 8>}]} {
    %c0 = arith.constant 0 : index
    %c0_0 = arith.constant 0 : index
    %0 = vector.load %arg1[%c0, %c0_0] : memref<8x16xf32, #tpu.memory_space<vmem>>, vector<8x16xf32>
    %c0_1 = arith.constant 0 : index
    %c0_2 = arith.constant 0 : index
    %1 = vector.load %arg2[%c0_1, %c0_2] : memref<16x64xf32, #tpu.memory_space<vmem>>, vector<16x64xf32>
    %cst = arith.constant dense<0.000000e+00> : vector<8x64xf32>
    %2 = tpu.matmul %0, %1, %cst {dimension_numbers = #tpu.dot_dimension_numbers<[1], [0], [0], [1], [0, 0, 1, 1], [], []>} : vector<8x16xf32>, vector<16x64xf32>, vector<8x64xf32> -> vector<8x64xf32>
    %c0_3 = arith.constant 0 : index
    %c0_4 = arith.constant 0 : index
    %3 = vector.load %arg3[%c0_3, %c0_4] : memref<1x64xf32, #tpu.memory_space<vmem>>, vector<1x64xf32>
    %4 = vector.broadcast %3 : vector<1x64xf32> to vector<8x64xf32>
    %5 = arith.addf %2, %4 : vector<8x64xf32>
    %cst_5 = arith.constant 0.000000e+00 : f32
    %6 = vector.broadcast %cst_5 : f32 to vector<8x64xf32>
    %7 = arith.maximumf %5, %6 : vector<8x64xf32>
    %c0_6 = arith.constant 0 : index
    %c0_7 = arith.constant 0 : index
    %8 = vector.load %arg4[%c0_6, %c0_7] : memref<64x64xf32, #tpu.memory_space<vmem>>, vector<64x64xf32>
    %cst_8 = arith.constant dense<0.000000e+00> : vector<8x64xf32>
    %9 = tpu.matmul %7, %8, %cst_8 {dimension_numbers = #tpu.dot_dimension_numbers<[1], [0], [0], [1], [0, 0, 1, 1], [], []>} : vector<8x64xf32>, vector<64x64xf32>, vector<8x64xf32> -> vector<8x64xf32>
    %c0_9 = arith.constant 0 : index
    %c0_10 = arith.constant 0 : index
    %10 = vector.load %arg5[%c0_9, %c0_10] : memref<1x64xf32, #tpu.memory_space<vmem>>, vector<1x64xf32>
    %11 = vector.broadcast %10 : vector<1x64xf32> to vector<8x64xf32>
    %12 = arith.addf %9, %11 : vector<8x64xf32>
    %cst_11 = arith.constant 0.000000e+00 : f32
    %13 = vector.broadcast %cst_11 : f32 to vector<8x64xf32>
    %14 = arith.maximumf %12, %13 : vector<8x64xf32>
    %c0_12 = arith.constant 0 : index
    %c0_13 = arith.constant 0 : index
    %15 = vector.load %arg6[%c0_12, %c0_13] : memref<64x128xf32, #tpu.memory_space<vmem>>, vector<64x128xf32>
    %cst_14 = arith.constant dense<0.000000e+00> : vector<8x128xf32>
    %16 = tpu.matmul %14, %15, %cst_14 {dimension_numbers = #tpu.dot_dimension_numbers<[1], [0], [0], [1], [0, 0, 1, 1], [], []>} : vector<8x64xf32>, vector<64x128xf32>, vector<8x128xf32> -> vector<8x128xf32>
    %c0_15 = arith.constant 0 : index
    %c0_16 = arith.constant 0 : index
    %17 = vector.load %arg7[%c0_15, %c0_16] : memref<1x128xf32, #tpu.memory_space<vmem>>, vector<1x128xf32>
    %18 = vector.broadcast %17 : vector<1x128xf32> to vector<8x128xf32>
    %19 = arith.addf %16, %18 : vector<8x128xf32>
    %20 = vector.extract_strided_slice %19 {offsets = [0, 0], sizes = [8, 8], strides = [1, 1]} : vector<8x128xf32> to vector<8x8xf32>
    %cst_17 = arith.constant dense<0xFF800000> : vector<8xf32>
    %21 = vector.multi_reduction <maximumf>, %20, %cst_17 [1] : vector<8x8xf32> to vector<8xf32>
    %22 = vector.shape_cast %21 : vector<8xf32> to vector<8x1xf32>
    %23 = vector.broadcast %22 : vector<8x1xf32> to vector<8x8xf32>
    %24 = arith.subf %20, %23 : vector<8x8xf32>
    %25 = math.exp %24 : vector<8x8xf32>
    %cst_18 = arith.constant dense<0.000000e+00> : vector<8xf32>
    %26 = vector.multi_reduction <add>, %25, %cst_18 [1] : vector<8x8xf32> to vector<8xf32>
    %27 = vector.shape_cast %26 : vector<8xf32> to vector<8x1xf32>
    %28 = vector.broadcast %27 : vector<8x1xf32> to vector<8x8xf32>
    %29 = arith.divf %25, %28 : vector<8x8xf32>
    %c0_19 = arith.constant 0 : index
    %c0_20 = arith.constant 0 : index
    %30 = vector.load %arg8[%c0_19, %c0_20] : memref<8x8xf32, #tpu.memory_space<vmem>>, vector<8x8xf32>
    tpu.vector_store %arg8[%c0_19, %c0_20], %29 {strides = array<i32>} : memref<8x8xf32, #tpu.memory_space<vmem>>, vector<8x8xf32>,
    return
  }
  func.func @transform_0(%arg0: i32) -> (i32, i32) {
    %c0_i32 = arith.constant 0 : i32
    %c0_i32_0 = arith.constant 0 : i32
    return %arg0, %c0_i32 : i32, i32
  }
  func.func @transform_1(%arg0: i32) -> (i32, i32) {
    %c0_i32 = arith.constant 0 : i32
    %c0_i32_0 = arith.constant 0 : i32
    %c0_i32_1 = arith.constant 0 : i32
    return %c0_i32, %c0_i32_0 : i32, i32
  }
  func.func @transform_2(%arg0: i32) -> (i32, i32) {
    %c0_i32 = arith.constant 0 : i32
    %c0_i32_0 = arith.constant 0 : i32
    %c0_i32_1 = arith.constant 0 : i32
    return %c0_i32, %c0_i32_0 : i32, i32
  }
  func.func @transform_3(%arg0: i32) -> (i32, i32) {
    %c0_i32 = arith.constant 0 : i32
    %c0_i32_0 = arith.constant 0 : i32
    %c0_i32_1 = arith.constant 0 : i32
    return %c0_i32, %c0_i32_0 : i32, i32
  }
  func.func @transform_4(%arg0: i32) -> (i32, i32) {
    %c0_i32 = arith.constant 0 : i32
    %c0_i32_0 = arith.constant 0 : i32
    %c0_i32_1 = arith.constant 0 : i32
    return %c0_i32, %c0_i32_0 : i32, i32
  }
  func.func @transform_5(%arg0: i32) -> (i32, i32) {
    %c0_i32 = arith.constant 0 : i32
    %c0_i32_0 = arith.constant 0 : i32
    %c0_i32_1 = arith.constant 0 : i32
    return %c0_i32, %c0_i32_0 : i32, i32
  }
  func.func @transform_6(%arg0: i32) -> (i32, i32) {
    %c0_i32 = arith.constant 0 : i32
    %c0_i32_0 = arith.constant 0 : i32
    %c0_i32_1 = arith.constant 0 : i32
    return %c0_i32, %c0_i32_0 : i32, i32
  }
  func.func @transform_7(%arg0: i32) -> (i32, i32) {
    %c0_i32 = arith.constant 0 : i32
    %c0_i32_0 = arith.constant 0 : i32
    return %arg0, %c0_i32 : i32, i32
  }
}

</mosaic_0001>

<bundles_post_ra>
// kernel: policy_network_forward.1
= control target key start
LH: loop header
LB: loop body
LE: loop exit
PB: predicated region body
PF: predicated region fallthrough
CT: control target
= control target key end

     0   :  { %v448_v2 = vmov 0.0|0.0   ;;  %vm449_vm0 = vmmov 0   ;;  %v450_v4 = vmov 0.0   ;;  %vm37_vm1 = vcmask 130048   ;;  %s576_s0 = inlined_call_operand.vmem [shape: f32[8,16], index: 0, kind: input, shape index: {}]   ;;  %s577_s1 = inlined_call_operand.vmem [shape: f32[16,64], index: 1, kind: input, shape index: {}]   ;;  %s578_s2 = inlined_call_operand.vmem [shape: f32[1,64], index: 2, kind: input, shape index: {}]   ;;  %s579_s3 = inlined_call_operand.vmem [shape: f32[64,64], index: 3, kind: input, shape index: {}]   ;;  %s580_s4 = inlined_call_operand.vmem [shape: f32[1,64], index: 4, kind: input, shape index: {}]   ;;  %s581_s5 = inlined_call_operand.vmem [shape: f32[64,128], index: 5, kind: input, shape index: {}]   ;;  %s582_s6 = inlined_call_operand.vmem [shape: f32[1,128], index: 6, kind: input, shape index: {}]   ;;  %s583_s7 = inlined_call_operand.hbm [shape: f32[8,8], index: 7, kind: output, shape index: {}]  }
   0x1   :  { %v28_v0 = vld [vmem:[%s577_s1] sm:$0xff]  ;;  %v29_v1 = vld [vmem:[%s577_s1 + $0x8] sm:$0xff]  ;;  %389 = vmatprep.subr.bf16.mxu0 %v448_v2  ;;  %348 = vmatprep.mubr.msk.f32.mxu0 %vm449_vm0, %v450_v4  ;;  %v114_v7 = vld [vmem:[%s579_s3 + $0x10] sm:$0xff] }
   0x2   :  { %v390_v3 = vpack.c.bf16 %v29_v1, %v28_v0  ;;  %v112_v5 = vld [vmem:[%s579_s3] sm:$0xff]  ;;  %v113_v6 = vld [vmem:[%s579_s3 + $0x8] sm:$0xff]  ;;  %392 = vmatprep.subr.bf16.mxu1 %v448_v2  ;;  %v115_v9 = vld [vmem:[%s579_s3 + $0x18] sm:$0xff]  ;;  %367 = vmatprep.mubr.msk.f32.mxu1 %vm449_vm0, %v450_v4 }
   0x3   :  { %v393_v8 = vpack.c.bf16 %v113_v6, %v112_v5  ;;  %v27_v10 = vld [vmem:[%s576_s0] sm:$0xff] }
   0x4   :  { %391 = vmatpush3.bf16.msra.mxu0 %v390_v3 }
   0x5   :  { %12 = vsyncpa [#allocation3], 0  ;;  %394 = vmatpush3.bf16.msra.mxu1 %v393_v8  ;;  %v396_v11 = vpack.c.bf16 %v115_v9, %v114_v7  ;;  %404 = vmatprep.subr.bf16.mxu0 %v448_v2  ;;  %v116_v12 = vld [vmem:[%s579_s3 + $0x20] sm:$0xff]  ;;  %v117_v13 = vld [vmem:[%s579_s3 + $0x28] sm:$0xff]  ;;  %vm127_vm2 = vcmask 523264   ;;  %vm290_vm3 = vcmask 64512  }
   0x6   :  { %395 = vmatprep.subr.bf16.mxu1 %v448_v2  ;;  %v399_v14 = vpack.c.bf16 %v117_v13, %v116_v12  ;;  %v118_v15 = vld [vmem:[%s579_s3 + $0x30] sm:$0xff]  ;;  %v119_v16 = vld [vmem:[%s579_s3 + $0x38] sm:$0xff]  ;;  %v202_v18 = vld [vmem:[%s581_s5] sm:$0xff] }
   0x7   :  { %349 = vmatmul.mubr.msk.f32.vlgmr.msra.gmra.mrb[0].mxu0 %vm37_vm1, %v27_v10  ;;  %v402_v17 = vpack.c.bf16 %v119_v16, %v118_v15  ;;  %v203_v19 = vld [vmem:[%s581_s5 + $0x8] sm:$0xff]  ;;  %v204_v20 = vld [vmem:[%s581_s5 + $0x10] sm:$0xff]  ;;  %v205_v22 = vld [vmem:[%s581_s5 + $0x18] sm:$0xff] }
   0x8   :  { %386 = vmatprep.mubr.msk.f32.mxu0 %vm449_vm0, %v450_v4  ;;  %v405_v21 = vpack.c.bf16 %v203_v19, %v202_v18  ;;  %v408_v23 = vpack.c.bf16 %v205_v22, %v204_v20  ;;  %v206_v24 = vld [vmem:[%s581_s5 + $0x20] sm:$0xff]  ;;  %v207_v25 = vld [vmem:[%s581_s5 + $0x28] sm:$0xff]  ;;  %v208_v32 = vld [vmem:[%s581_s5 + $0x30] sm:$0xff] }
   0x9   :  { %397 = vmatpush3.bf16.msra.mxu1 %v396_v11  ;;  %v411_v26 = vpack.c.bf16 %v207_v25, %v206_v24  ;;  %v317_v27 = vld [vmem:[%s578_s2] ss:$0 sm:$0xff]  ;;  %v209_v33 = vld [vmem:[%s581_s5 + $0x38] sm:$0xff] }
   0xa   :  { %398 = vmatprep.subr.bf16.mxu1 %v448_v2  ;;  %406 = vmatpush3.bf16.msra.mxu0 %v405_v21  ;;  %v414_v34 = vpack.c.bf16 %v209_v33, %v208_v32  ;;  %v319_v35 = vld [vmem:[%s580_s4] ss:$0 sm:$0xff]  ;;  %s451_s4 = smov [#allocation2]  }
   0xb   :  { %407 = vmatprep.subr.bf16.mxu0 %v448_v2  ;;  %v321_v40 = vld [vmem:[%s582_s6] ss:$0 sm:$0xff]  ;;  %s309_s5 = sshll.u32 %s451_s4, 4  ;;  %s310_s5 = int_to_ptr.vmem [resolvable:$true] %s309_s5 }
   0xc   :  { %s424_s6 = scalar_lea.vmem %s310_s5, 128  ;;  %p429_p1 = scmp.lt.s32.totalorder %s310_s5, %s310_s5 }
   0xd   :  { %400 = vmatpush3.bf16.msra.mxu1 %v399_v14  ;;  %p425_p0 = scmp.ne.s32.totalorder %s310_s5, %s424_s6  ;;  %p430_p2 = scmp.lt.s32.totalorder %s424_s6, %s424_s6 }
   0xe   :  { %401 = vmatprep.subr.bf16.mxu1 %v448_v2  ;;  %409 = vmatpush3.bf16.msra.mxu0 %v408_v23 }
   0xf   :  { %410 = vmatprep.subr.bf16.mxu0 %v448_v2  ;;  %p431_p3 = por %p430_p2, %p429_p1 }
  0x11   :  { %403 = vmatpush3.bf16.msra.mxu1 %v402_v17  ;;  %p432_p4 = pnand %p431_p3, %p425_p0 }
  0x12   :  { %412 = vmatpush3.bf16.msra.mxu0 %v411_v26 }
  0x13   :  { %413 = vmatprep.subr.bf16.mxu0 %v448_v2 }
  0x16   :  { %415 = vmatpush3.bf16.msra.mxu0 %v414_v34 }
  0xda   :  { %v107_v28 = vpop.f32.mrb[0].mxu0 }
  0xdb   :  { %v108_v29 = vadd.f32 %v317_v27, %v107_v28  ;;  %v350_v30 = vpop.f32.mrb[1].mxu0 }
  0xdd   :  { %v111_v31 = vmax.f32 %v108_v29, 0.0 }
  0xdf   :  { %368 = vmatmul.mubr.msk.f32.vlgmr.msra.gmra.mrb[0].mxu1 %vm127_vm2, %v111_v31 }
 0x1b2   :  { %v197_v36 = vpop.f32.mrb[0].mxu1 }
 0x1b3   :  { %v198_v37 = vadd.f32 %v319_v35, %v197_v36  ;;  %v369_v38 = vpop.f32.mrb[1].mxu1 }
 0x1b5   :  { %v201_v39 = vmax.f32 %v198_v37, 0.0 }
 0x1b7   :  { %387 = vmatmul.mubr.msk.f32.vlgmr.msra.gmra.mrb[2].mxu0 %vm127_vm2, %v201_v39 }
 0x28a   :  { %v286_v41 = vpop.f32.mrb[2].mxu0 }
 0x28b   :  { %v287_v42 = vadd.f32 %v321_v40, %v286_v41  ;;  %v388_v43 = vpop.f32.mrb[3].mxu0 }
 0x28d   :  { %v291_v44 = vsel %vm290_vm3, %v287_v42, -inf }
 0x28e   :  { %292 = vmax.xlane.f32.xlu0 %v291_v44 }
 0x31b   :  { %v293_v45 = vpop.xlane.xlu0 %292 }
 0x31c   :  { %v294_v46 = vsub.f32 %v287_v42, %v293_v45 }
 0x31e   :  { %v295_v47 = vmul.f32 1.442695, %v294_v46 }
 0x320   :  { %420 = vpow2.f32 %v295_v47 }
 0x32a   :  { %v421_v48 = vpop.eup %420 }
 0x32b   :  { %v297_v49 = vsel %vm290_vm3, %v421_v48, 0.0 }
 0x32c   :  { %298 = vadd.xlane.f32.xlu0 %v297_v49 }
 0x3b9   :  { %v299_v50 = vpop.xlane.xlu0 %298 }
 0x3ba   :  { %422 = vrcp.f32 %v299_v50 }
 0x3c4   :  { %v423_v51 = vpop.eup %422 }
 0x3c5   :  { %v301_v52 = vmul.f32 %v423_v51, %v421_v48 }
 0x3c7   :  { %302 = vst.msk [vmem:[#allocation2] sm:$0xff] %vm290_vm3, %v301_v52 }
 0x3c8   :  { %435 = shalt.err (!%p432_p4)
}
 0x3c9   :  { %s436_s18 = scalar_lea.hbm %s583_s7, 128 }
 0x3ca   :  { %p437_p5 = scmp.ne.s32.totalorder %s583_s7, %s436_s18  ;;  %p440_p6 = scmp.lt.u32.totalorder %s436_s18, %s583_s7 }
 0x3cc   :  { %p442_p7 = pnand %p440_p6, %p437_p5 }
 0x3ce   :  { %445 = shalt.err (!%p442_p7)
}
 0x3cf   :  { %312 = dma.vmem_to_hbm [thread:$0]  %s310_s5, 128, %s583_s7, [#allocation3]  }
 0x3d0   :  { %446 = dma.done.wait [#allocation3], 128  }
 0x3d1   :  { %447 = vsyncadd [#allocation3], 4294967168 }
 0x3d2   :  { %316 = vsyncpa [#allocation3], 1 }

</bundles_post_ra>
